<compile_context>
chip_gen: v7x
topology: tpu7x:2x2x1
jax: 0.10.0
libtpu: 0.0.40
codegen_flags: <defaults>
</compile_context>

<pallas_src>
import numpy as np
import jax
import jax.numpy as jnp
from jax.experimental import pallas as pl
from jax.experimental.pallas import tpu as pltpu

EPS = 1e-4  # scn.BatchNormReLU default eps
_VMEM_LIMIT = 48 * 1024 * 1024  # headroom under v7x's 64 MiB physical VMEM


def _round_up(x, m):
    return ((x + m - 1) // m) * m


def _choose_tile(n):
    """Row-tile size: multiple of 8 sublanes, capped at 256 rows."""
    return min(256, max(8, _round_up(n, 8)))


# ------------------------------------------------------------------
# Pallas kernels
# ------------------------------------------------------------------
def _conv_kernel(g_ref, w_ref, o_ref):
    # One K-folded rulebook matmul per N-tile: bf16 x bf16 -> f32 (MXU).
    o_ref[...] = jnp.dot(g_ref[...], w_ref[...], preferred_element_type=jnp.float32)


def sparse_conv_matmul(gathered, weights):
    """out[n, cout] = sum_{k,cin} gathered[n, k*Cin+cin] * weights[k, cin, cout].

    gathered: [N, K*Cin] bf16 (rulebook-gathered, zero-filled for inactive).
    weights : [K, Cin, Cout] f32.
    Returns : [N, Cout] f32.
    """
    N, KCin = gathered.shape
    K, Cin, Cout = weights.shape
    assert K * Cin == KCin

    # Fold K into the contraction dim; pad Cout to 128 lanes for unmasked stores.
    cout_pad = _round_up(Cout, 128)
    w = weights.reshape(KCin, Cout).astype(jnp.bfloat16)
    if cout_pad != Cout:
        w = jnp.pad(w, ((0, 0), (0, cout_pad - Cout)))

    tn = _choose_tile(N)
    n_pad = _round_up(N, tn)
    g = gathered if n_pad == N else jnp.pad(gathered, ((0, n_pad - N), (0, 0)))

    out = pl.pallas_call(
        _conv_kernel,
        out_shape=jax.ShapeDtypeStruct((n_pad, cout_pad), jnp.float32),
        grid=(n_pad // tn,),
        in_specs=[pl.BlockSpec((tn, KCin), lambda i: (i, 0)),
                  pl.BlockSpec((KCin, cout_pad), lambda i: (0, 0))],  # resident weights
        out_specs=pl.BlockSpec((tn, cout_pad), lambda i: (i, 0)),
        compiler_params=pltpu.CompilerParams(
            dimension_semantics=("parallel",),
            vmem_limit_bytes=_VMEM_LIMIT),
    )(g, w)
    return out[:N, :Cout]


def _bn_stats_kernel(x_ref, sum_ref, sq_ref):
    i = pl.program_id(0)

    @pl.when(i == 0)
    def _():
        sum_ref[...] = jnp.zeros_like(sum_ref)
        sq_ref[...] = jnp.zeros_like(sq_ref)

    x = x_ref[...]
    sum_ref[...] += jnp.sum(x, axis=0, keepdims=True)
    sq_ref[...] += jnp.sum(x * x, axis=0, keepdims=True)


def _bn_apply_kernel(x_ref, scale_ref, shift_ref, o_ref):
    y = x_ref[...] * scale_ref[...] + shift_ref[...]
    o_ref[...] = jnp.maximum(y, 0.0).astype(o_ref.dtype)  # leakiness=0 -> plain ReLU


def bn_relu(x, gamma, beta, out_dtype=jnp.bfloat16):
    """scn.BatchNormReLU over all active sites (training-mode batch statistics).

    Two tiled passes: (1) sum/sumsq reduction accumulated over N tiles (f32),
    (2) normalize + ReLU per tile, emitted directly in `out_dtype` (bf16 when
    feeding a conv, f32 for the network output).
    """
    N, C = x.shape
    tn = _choose_tile(N)
    n_pad = _round_up(N, tn)
    xp = x.astype(jnp.float32)
    if n_pad != N:
        xp = jnp.pad(xp, ((0, n_pad - N), (0, 0)))  # zero rows don't affect sums
    n_tiles = n_pad // tn

    s, sq = pl.pallas_call(
        _bn_stats_kernel,
        out_shape=(jax.ShapeDtypeStruct((1, C), jnp.float32),
                   jax.ShapeDtypeStruct((1, C), jnp.float32)),
        grid=(n_tiles,),
        in_specs=[pl.BlockSpec((tn, C), lambda i: (i, 0))],
        out_specs=(pl.BlockSpec((1, C), lambda i: (0, 0)),
                   pl.BlockSpec((1, C), lambda i: (0, 0))),
        compiler_params=pltpu.CompilerParams(
            dimension_semantics=("arbitrary",),
            vmem_limit_bytes=_VMEM_LIMIT),
    )(xp)

    mean = s / N
    var = sq / N - mean * mean
    inv = jax.lax.rsqrt(var + EPS)
    scale = (gamma.reshape(1, C) * inv).astype(jnp.float32)
    shift = (beta.reshape(1, C) - mean * gamma.reshape(1, C) * inv).astype(jnp.float32)

    y = pl.pallas_call(
        _bn_apply_kernel,
        out_shape=jax.ShapeDtypeStruct((n_pad, C), out_dtype),
        grid=(n_tiles,),
        in_specs=[pl.BlockSpec((tn, C), lambda i: (i, 0)),
                  pl.BlockSpec((1, C), lambda i: (0, 0)),
                  pl.BlockSpec((1, C), lambda i: (0, 0))],
        out_specs=pl.BlockSpec((tn, C), lambda i: (i, 0)),
        compiler_params=pltpu.CompilerParams(
            dimension_semantics=("parallel",),
            vmem_limit_bytes=_VMEM_LIMIT),
    )(xp, scale, shift)
    return y[:N]


# ------------------------------------------------------------------
# Host-side rulebook construction (hash tables -> static index arrays)
# ------------------------------------------------------------------
def _hash(coords):
    return {tuple(int(v) for v in c): i for i, c in enumerate(coords)}


def submanifold_rulebook(coords):
    """3x3x3 submanifold conv: idx[k, i] = active neighbour of site i at offset k, else -1."""
    h = _hash(coords)
    offs = [(dx, dy, dz) for dx in (-1, 0, 1) for dy in (-1, 0, 1) for dz in (-1, 0, 1)]
    idx = np.full((len(offs), len(coords)), -1, np.int32)
    for k, (dx, dy, dz) in enumerate(offs):
        for i, c in enumerate(coords):
            idx[k, i] = h.get((int(c[0]) + dx, int(c[1]) + dy, int(c[2]) + dz, int(c[3])), -1)
    return idx


def downsample_coords(coords):
    coarse = np.array(coords, copy=True)
    coarse[:, :3] //= 2
    return np.unique(coarse, axis=0)


def strided_conv_rulebook(fine_coords, coarse_coords):
    """Convolution(kernel=2, stride=2): idx[k, o] = fine input of coarse site o at offset k."""
    h = _hash(fine_coords)
    offs = [(a, b, c) for a in (0, 1) for b in (0, 1) for c in (0, 1)]
    idx = np.full((8, len(coarse_coords)), -1, np.int32)
    for k, (dx, dy, dz) in enumerate(offs):
        for o, c in enumerate(coarse_coords):
            idx[k, o] = h.get((int(c[0]) * 2 + dx, int(c[1]) * 2 + dy,
                               int(c[2]) * 2 + dz, int(c[3])), -1)
    return idx


def deconv_rulebook(fine_coords, coarse_coords):
    """Deconvolution(kernel=2, stride=2): transpose of the strided conv rulebook."""
    hc = _hash(coarse_coords)
    idx = np.full((8, len(fine_coords)), -1, np.int32)
    for i, c in enumerate(fine_coords):
        k = (int(c[0]) % 2) * 4 + (int(c[1]) % 2) * 2 + (int(c[2]) % 2)
        idx[k, i] = hc[(int(c[0]) // 2, int(c[1]) // 2, int(c[2]) // 2, int(c[3]))]
    return idx


def gather_rows(feats, idx):
    """JAX glue: zero-filled gather -> [Nout, K*Cin] bf16 for the K-folded rulebook matmul."""
    # TODO(synk): for large point clouds do this gather inside the conv kernel via
    # PrefetchScalarGridSpec (rulebook in SMEM) to avoid materializing the K*Cin
    # expanded tensor in HBM; kept in XLA here for the small demo.
    feats = feats.astype(jnp.bfloat16)
    nin, c = feats.shape
    padded = jnp.concatenate([feats, jnp.zeros((1, c), jnp.bfloat16)], axis=0)
    safe = jnp.where(idx < 0, nin, idx)          # [K, Nout]
    g = padded[safe.T]                           # [Nout, K, Cin]
    return g.reshape(g.shape[0], -1)             # [Nout, K*Cin]


# ------------------------------------------------------------------
# Parameters (deterministic, SCN-style init)
# ------------------------------------------------------------------
def init_params(key, in_channels, m, num_planes):
    planes = [(n + 1) * m for n in range(num_planes)]
    params = {}
    ctr = [0]

    def nkey():
        ctr[0] += 1
        return jax.random.fold_in(key, ctr[0])

    def conv_w(fv, cin, cout):
        std = (2.0 / (cin * fv)) ** 0.5
        return std * jax.random.normal(nkey(), (fv, cin, cout), jnp.float32)

    def bn(c):
        return jnp.ones((c,), jnp.float32), jnp.zeros((c,), jnp.float32)

    params['stem_w'] = conv_w(27, in_channels, m)     # SubmanifoldConvolution(in, m, 3)

    def build(pls, prefix):
        a = pls[0]
        params[prefix + 'b0_bn'] = bn(a)
        params[prefix + 'b0_w'] = conv_w(27, a, a)
        if len(pls) > 1:
            params[prefix + 'down_bn'] = bn(a)
            params[prefix + 'down_w'] = conv_w(8, a, pls[1])
            build(pls[1:], prefix + 'u.')
            params[prefix + 'up_bn'] = bn(pls[1])
            params[prefix + 'up_w'] = conv_w(8, pls[1], a)
            params[prefix + 'b1_bn'] = bn(2 * a)
            params[prefix + 'b1_w'] = conv_w(27, 2 * a, a)

    build(planes, 'u.')
    params['final_bn'] = bn(m)                        # scn.BatchNormReLU(m)
    return params, planes


# ------------------------------------------------------------------
# Forward pass (mirrors scn.UNet recursion, block_reps=1, residual_blocks=False)
# ------------------------------------------------------------------
def unet_level(feats, coords, planes, params, prefix):
    sub_idx = jnp.asarray(submanifold_rulebook(coords))
    g, b = params[prefix + 'b0_bn']
    x = bn_relu(feats, g, b)                                       # bf16 out
    x = sparse_conv_matmul(gather_rows(x, sub_idx), params[prefix + 'b0_w'])
    if len(planes) > 1:
        identity = x
        g, b = params[prefix + 'down_bn']
        y = bn_relu(x, g, b)
        coarse = downsample_coords(coords)
        down_idx = jnp.asarray(strided_conv_rulebook(coords, coarse))
        y = sparse_conv_matmul(gather_rows(y, down_idx), params[prefix + 'down_w'])
        y = unet_level(y, coarse, planes[1:], params, prefix + 'u.')
        g, b = params[prefix + 'up_bn']
        y = bn_relu(y, g, b)
        up_idx = jnp.asarray(deconv_rulebook(coords, coarse))
        y = sparse_conv_matmul(gather_rows(y, up_idx), params[prefix + 'up_w'])
        x = jnp.concatenate([identity, y], axis=1)                 # scn.JoinTable
        g, b = params[prefix + 'b1_bn']
        x = bn_relu(x, g, b)
        x = sparse_conv_matmul(gather_rows(x, sub_idx), params[prefix + 'b1_w'])
    return x


def unet_scn_forward(point_coords, point_feats, params, planes, full_scale):
    # scn.InputLayer(3, full_scale, mode=4): dedup points into voxels, averaging features.
    # TODO(synk): rulebook construction / voxel dedup (dynamic-shape hash ops) run on host
    # NumPy; they have no static-shape Pallas equivalent.
    pc = np.array(point_coords, copy=True)
    pc[:, :3] = np.clip(pc[:, :3], 0, full_scale - 1)
    voxel_coords, inverse = np.unique(pc, axis=0, return_inverse=True)
    inv = jnp.asarray(inverse.astype(np.int32))
    n_vox = voxel_coords.shape[0]
    sums = jax.ops.segment_sum(point_feats, inv, num_segments=n_vox)
    counts = jax.ops.segment_sum(jnp.ones((pc.shape[0], 1), jnp.float32), inv,
                                 num_segments=n_vox)
    vfeat = sums / counts

    # stem SubmanifoldConvolution(in_channels, m, 3, bias=False)
    sub_idx = jnp.asarray(submanifold_rulebook(voxel_coords))
    vfeat = sparse_conv_matmul(gather_rows(vfeat, sub_idx), params['stem_w'])

    # scn.UNet(...)
    vfeat = unet_level(vfeat, voxel_coords, planes, params, 'u.')

    # scn.BatchNormReLU(m)  (network output -> keep f32)
    g, b = params['final_bn']
    vfeat = bn_relu(vfeat, g, b, out_dtype=jnp.float32)

    # scn.OutputLayer(3): map voxel features back to the original input points.
    return vfeat[inv]


# ------------------------------------------------------------------
if __name__ == "__main__":
    in_channels = 4
    m = 16
    num_planes = 4          # UNet depth (module default is 7; kept small for the demo)
    full_scale = 4096       # module default
    n_points = 128
    batch = 2

    key = jax.random.PRNGKey(0)
    k_xyz, k_b, k_f, k_p = jax.random.split(key, 4)
    xyz = jax.random.randint(k_xyz, (n_points, 3), 0, 32, dtype=jnp.int32)
    bidx = jax.random.randint(k_b, (n_points, 1), 0, batch, dtype=jnp.int32)
    coords = np.asarray(jnp.concatenate([xyz, bidx], axis=1))        # [N, 4] (x,y,z,b)
    feats = jax.random.normal(k_f, (n_points, in_channels), jnp.float32)

    params, planes = init_params(k_p, in_channels, m, num_planes)

    out = unet_scn_forward(coords, feats, params, planes, full_scale)
    out = jax.block_until_ready(out)
    assert out.shape == (n_points, m) and out.dtype == jnp.float32
    assert bool(jnp.all(jnp.isfinite(out)))
    print("KERNEL_OK")
</pallas_src>

<mosaic_0001>
module attributes {stable_mosaic.version = 11 : i64} {
  func.func @_conv_kernel(%arg0: i32, %arg1: memref<128x108xbf16, #tpu.memory_space<vmem>>, %arg2: memref<108x128xbf16, #tpu.memory_space<vmem>>, %arg3: memref<128x128xf32, #tpu.memory_space<vmem>>) attributes {dimension_semantics = [#tpu.dimension_semantics<parallel>], iteration_bounds = array<i64: 1>, scalar_prefetch = 0 : i64, scratch_operands = 0 : i64, tpu.core_type = #tpu.core_type<tc>, window_params = [{transform_indices = @transform_0, window_bounds = array<i64: 128, 108>}, {pipeline_mode = #tpu.pipeline_mode<synchronous>, transform_indices = @transform_1, window_bounds = array<i64: 108, 128>}, {transform_indices = @transform_2, window_bounds = array<i64: 128, 128>}]} {
    %c0 = arith.constant 0 : index
    %c0_0 = arith.constant 0 : index
    %0 = vector.load %arg1[%c0, %c0_0] : memref<128x108xbf16, #tpu.memory_space<vmem>>, vector<128x108xbf16>
    %c0_1 = arith.constant 0 : index
    %c0_2 = arith.constant 0 : index
    %1 = vector.load %arg2[%c0_1, %c0_2] : memref<108x128xbf16, #tpu.memory_space<vmem>>, vector<108x128xbf16>
    %cst = arith.constant dense<0.000000e+00> : vector<128x128xf32>
    %2 = tpu.matmul %0, %1, %cst {dimension_numbers = #tpu.dot_dimension_numbers<[1], [0], [0], [1], [0, 0, 1, 1], [], []>} : vector<128x108xbf16>, vector<108x128xbf16>, vector<128x128xf32> -> vector<128x128xf32>
    %c0_3 = arith.constant 0 : index
    %c0_4 = arith.constant 0 : index
    %3 = vector.load %arg3[%c0_3, %c0_4] : memref<128x128xf32, #tpu.memory_space<vmem>>, vector<128x128xf32>
    tpu.vector_store %arg3[%c0_3, %c0_4], %2 {strides = array<i32>} : memref<128x128xf32, #tpu.memory_space<vmem>>, vector<128x128xf32>,
    return
  }
  func.func @transform_0(%arg0: i32) -> (i32, i32) {
    %c0_i32 = arith.constant 0 : i32
    %c0_i32_0 = arith.constant 0 : i32
    return %arg0, %c0_i32 : i32, i32
  }
  func.func @transform_1(%arg0: i32) -> (i32, i32) {
    %c0_i32 = arith.constant 0 : i32
    %c0_i32_0 = arith.constant 0 : i32
    %c0_i32_1 = arith.constant 0 : i32
    return %c0_i32, %c0_i32_0 : i32, i32
  }
  func.func @transform_2(%arg0: i32) -> (i32, i32) {
    %c0_i32 = arith.constant 0 : i32
    %c0_i32_0 = arith.constant 0 : i32
    return %arg0, %c0_i32 : i32, i32
  }
}

</mosaic_0001>

<bundles_post_ra>
// kernel: tpu_custom_call.1
= control target key start
LH: loop header
LB: loop body
LE: loop exit
PB: predicated region body
PF: predicated region fallthrough
CT: control target
= control target key end

     0   :  { %vm124_vm0 = vcmask 883712   ;;  %s491_s0 = inlined_call_operand.vmem [shape: bf16[128,108], index: 0, kind: input, shape index: {}]   ;;  %s492_s1 = inlined_call_operand.vmem [shape: bf16[108,128], index: 1, kind: input, shape index: {}]   ;;  %s493_s2 = inlined_call_operand.hbm [shape: f32[128,128], index: 2, kind: output, shape index: {}]  }
   0x1   :  { %v369_v0 = vld [vmem:[%s492_s1] sm:$0xff]   ;;  %v370_v1 = vld [vmem:[%s492_s1 + $0x8] sm:$0xff]   ;;  %v371_v2 = vld [vmem:[%s492_s1 + $0x10] sm:$0xff]  }
   0x2   :  { %320 = vmatprep.subr.bf16.mxu0 %v369_v0  ;;  %350 = vmatprep.subr.bf16.mxu1 %v369_v0  ;;  %v372_v3 = vld [vmem:[%s492_s1 + $0x18] sm:$0xff]   ;;  %v376_v4 = vld [vmem:[%s491_s0] sm:$0xff]  }
   0x3   :  { %321 = vmatpush3.bf16.msra.mxu0 %v369_v0  ;;  %357 = vmatpush3.bf16.msra.mxu1 %v369_v0  ;;  %v377_v5 = vld [vmem:[%s491_s0 + $0x20] sm:$0xff]  }
   0x4   :  { %322 = vmatprep.subr.bf16.mxu0 %v370_v1  ;;  %351 = vmatprep.subr.bf16.mxu1 %v370_v1  ;;  %v373_v6 = vld [vmem:[%s492_s1 + $0x20] sm:$0xff]  }
   0x5   :  { %334 = vmatprep.mubr.msk.bf16.mxu0 %vm124_vm0, %v376_v4  ;;  %342 = vmatprep.mubr.msk.bf16.mxu1 %vm124_vm0, %v377_v5 }
   0x7   :  { %323 = vmatpush3.bf16.msra.mxu0 %v370_v1  ;;  %358 = vmatpush3.bf16.msra.mxu1 %v370_v1 }
   0x8   :  { %324 = vmatprep.subr.bf16.mxu0 %v371_v2  ;;  %352 = vmatprep.subr.bf16.mxu1 %v371_v2 }
   0xb   :  { %325 = vmatpush3.bf16.msra.mxu0 %v371_v2  ;;  %359 = vmatpush3.bf16.msra.mxu1 %v371_v2 }
   0xc   :  { %326 = vmatprep.subr.bf16.mxu0 %v372_v3  ;;  %353 = vmatprep.subr.bf16.mxu1 %v372_v3 }
   0xf   :  { %327 = vmatpush3.bf16.msra.mxu0 %v372_v3  ;;  %360 = vmatpush3.bf16.msra.mxu1 %v372_v3 }
  0x10   :  { %7 = vsyncpa [#allocation3], 0  ;;  %328 = vmatprep.subr.bf16.mxu0 %v373_v6  ;;  %354 = vmatprep.subr.bf16.mxu1 %v373_v6  ;;  %v374_v7 = vld [vmem:[%s492_s1 + $0x28] sm:$0xff]   ;;  %v375_v8 = vld [vmem:[%s492_s1 + $0x30] sm:$0x3f]   ;;  %vm149_vm1 = vcmask 1045504  }
  0x11   :  { %v151_v9 = vsel %vm149_vm1, %v375_v8, 0  ;;  %v378_v10 = vld [vmem:[%s491_s0 + $0x8] sm:$0xff]   ;;  %v380_v12 = vld [vmem:[%s491_s0 + $0x10] sm:$0xff]   ;;  %v382_v14 = vld [vmem:[%s491_s0 + $0x18] sm:$0xff]  }
  0x12   :  { %v379_v11 = vld [vmem:[%s491_s0 + $0x28] sm:$0xff]   ;;  %v381_v13 = vld [vmem:[%s491_s0 + $0x30] sm:$0xff]   ;;  %v383_v15 = vld [vmem:[%s491_s0 + $0x38] sm:$0xff]   ;;  %s408_s0 = smov [#allocation2]  }
  0x13   :  { %329 = vmatpush3.bf16.msra.mxu0 %v373_v6  ;;  %361 = vmatpush3.bf16.msra.mxu1 %v373_v6  ;;  %s271_s10 = sshll.u32 %s408_s0, 4  ;;  %s272_s10 = int_to_ptr.vmem [resolvable:$true] %s271_s10 }
  0x14   :  { %330 = vmatprep.subr.bf16.mxu0 %v374_v7  ;;  %355 = vmatprep.subr.bf16.mxu1 %v374_v7  ;;  %s384_s11 = scalar_lea.vmem %s272_s10, 2048  ;;  %p389_p1 = scmp.lt.s32.totalorder %s272_s10, %s272_s10 }
  0x15   :  { %p385_p0 = scmp.ne.s32.totalorder %s272_s10, %s384_s11  ;;  %p390_p2 = scmp.lt.s32.totalorder %s384_s11, %s384_s11 }
  0x17   :  { %331 = vmatpush3.bf16.msra.mxu0 %v374_v7  ;;  %362 = vmatpush3.bf16.msra.mxu1 %v374_v7  ;;  %p391_p3 = por %p390_p2, %p389_p1 }
  0x18   :  { %364 = vmatprep.subr.msk.bf16.mxu0 %vm149_vm1, %v375_v8  ;;  %365 = vmatprep.subr.msk.bf16.mxu1 %vm149_vm1, %v375_v8 }
  0x19   :  { %p392_p4 = pnand %p391_p3, %p385_p0 }
  0x1b   :  { %333 = vmatpush3.bf16.msra.mxu0 %v151_v9  ;;  %363 = vmatpush3.bf16.msra.mxu1 %v151_v9 }
  0x1e   :  { %335 = vmatmul.mubr.msk.bf16.vlgmr.msra.gmra.mrb[0].mxu0 %vm124_vm0, %v378_v10  ;;  %343 = vmatmul.mubr.msk.bf16.vlgmr.msra.gmra.mrb[0].mxu1 %vm124_vm0, %v379_v11 }
  0x1f   :  { %338 = vmatprep.mubr.msk.bf16.mxu0 %vm124_vm0, %v380_v12  ;;  %346 = vmatprep.mubr.msk.bf16.mxu1 %vm124_vm0, %v381_v13 }
  0x26   :  { %339 = vmatmul.mubr.msk.bf16.gmra.mrb[4].mxu0 %vm124_vm0, %v382_v14  ;;  %347 = vmatmul.mubr.msk.bf16.gmra.mrb[4].mxu1 %vm124_vm0, %v383_v15 }
  0xf1   :  { %v336_v16 = vpop.f32.mrb[0].mxu0  ;;  %v344_v17 = vpop.f32.mrb[0].mxu1 }
  0xf2   :  { %252 = vst [vmem:[#allocation2 + $0x10] sm:$0xff] %v336_v16  ;;  %260 = vst [vmem:[#allocation2 + $0x50] sm:$0xff] %v344_v17  ;;  %v187_v18 = vpop.f32.mrb[1].mxu0  ;;  %v219_v19 = vpop.f32.mrb[1].mxu1 }
  0xf3   :  { %250 = vst [vmem:[#allocation2] sm:$0xff] %v187_v18  ;;  %258 = vst [vmem:[#allocation2 + $0x40] sm:$0xff] %v219_v19  ;;  %v337_v20 = vpop.f32.mrb[2].mxu0  ;;  %v345_v21 = vpop.f32.mrb[2].mxu1 }
  0xf4   :  { %253 = vst [vmem:[#allocation2 + $0x18] sm:$0xff] %v337_v20  ;;  %261 = vst [vmem:[#allocation2 + $0x58] sm:$0xff] %v345_v21  ;;  %v190_v22 = vpop.f32.mrb[3].mxu0  ;;  %v222_v23 = vpop.f32.mrb[3].mxu1 }
  0xf5   :  { %251 = vst [vmem:[#allocation2 + $0x8] sm:$0xff] %v190_v22  ;;  %259 = vst [vmem:[#allocation2 + $0x48] sm:$0xff] %v222_v23 }
  0xf9   :  { %v340_v24 = vpop.f32.mrb[4].mxu0  ;;  %v348_v25 = vpop.f32.mrb[4].mxu1 }
  0xfa   :  { %256 = vst [vmem:[#allocation2 + $0x30] sm:$0xff] %v340_v24  ;;  %264 = vst [vmem:[#allocation2 + $0x70] sm:$0xff] %v348_v25  ;;  %v203_v26 = vpop.f32.mrb[5].mxu0  ;;  %v235_v27 = vpop.f32.mrb[5].mxu1 }
  0xfb   :  { %254 = vst [vmem:[#allocation2 + $0x20] sm:$0xff] %v203_v26  ;;  %262 = vst [vmem:[#allocation2 + $0x60] sm:$0xff] %v235_v27  ;;  %v341_v28 = vpop.f32.mrb[6].mxu0  ;;  %v349_v29 = vpop.f32.mrb[6].mxu1 }
  0xfc   :  { %257 = vst [vmem:[#allocation2 + $0x38] sm:$0xff] %v341_v28  ;;  %265 = vst [vmem:[#allocation2 + $0x78] sm:$0xff] %v349_v29  ;;  %v206_v30 = vpop.f32.mrb[7].mxu0  ;;  %v238_v31 = vpop.f32.mrb[7].mxu1 }
  0xfd   :  { %255 = vst [vmem:[#allocation2 + $0x28] sm:$0xff] %v206_v30  ;;  %263 = vst [vmem:[#allocation2 + $0x68] sm:$0xff] %v238_v31 }
  0xfe   :  { %395 = shalt.err (!%p392_p4)
}
  0xff   :  { %s396_s14 = scalar_lea.hbm %s493_s2, 2048 }
 0x100   :  { %p397_p5 = scmp.ne.s32.totalorder %s493_s2, %s396_s14  ;;  %p400_p6 = scmp.lt.u32.totalorder %s396_s14, %s493_s2 }
 0x102   :  { %p402_p7 = pnand %p400_p6, %p397_p5 }
 0x104   :  { %405 = shalt.err (!%p402_p7)
}
 0x105   :  { %s409_s19 = smov 128   ;;  %s410_s20 = smov 8  }
 0x106   :  { %277 = dma.vmem_to_hbm [thread:$0]  %s272_s10, 2048, %s493_s2, [#allocation3], %s409_s19, %s409_s19, %s410_s20  }
 0x107   :  { %406 = dma.done.wait [#allocation3], 2048  }
 0x108   :  { %407 = vsyncadd [#allocation3], 4294965248 }
 0x109   :  { %281 = vsyncpa [#allocation3], 1 }

</bundles_post_ra>
